<compile_context>
chip_gen: v6e
topology: v6e:2x2x1
jax: 0.10.0
libtpu: 0.0.40
codegen_flags: <defaults>
</compile_context>

<pallas_src>
import functools

import jax
import jax.numpy as jnp
from jax.experimental import pallas as pl
from jax.experimental.pallas import tpu as pltpu


def _round_up(x, m):
    return (x + m - 1) // m * m


# ---------------------------------------------------------------------------
# Kernels
# ---------------------------------------------------------------------------

def _layernorm_epilogue(h_f32, res_ref, consts_ref, o_ref, eps, inv_h):
    """h_f32: (tm, H) f32 dense output (pre-bias). Fused residual + LayerNorm."""
    consts = consts_ref[...]            # (3, H) f32
    bias = consts[0:1, :]
    gamma = consts[1:2, :]
    beta = consts[2:3, :]

    # TODO(synk): dropout is identity here (inference / eval mode); training
    # dropout would use pltpu.prng_seed + pltpu.prng_random_bits.
    y = h_f32 + bias + res_ref[...].astype(jnp.float32)

    # Single-pass statistics: var = E[y^2] - mean^2 (clamped >= 0).  Saves a
    # full (tm, H) VALU pass vs. the two-pass centered formulation; f32
    # accumulation + clamp + eps keep it numerically safe for LN-scale inputs.
    mean = jnp.sum(y, axis=-1, keepdims=True) * inv_h
    mean_sq = jnp.sum(y * y, axis=-1, keepdims=True) * inv_h
    var = jnp.maximum(mean_sq - mean * mean, 0.0)
    inv_std = jax.lax.rsqrt(var + eps)
    o_ref[...] = ((y - mean) * inv_std * gamma + beta).astype(o_ref.dtype)


def _kernel_single(x_ref, res_ref, w_ref, consts_ref, o_ref, *, eps, inv_h):
    # Whole-K contraction: x (tm, H) @ w (H, H) -- weight pre-transposed in
    # the wrapper, so this is a standard (1,0) contraction (no in-kernel
    # transpose / relayout).  f32 accumulation on the MXU.
    h = jax.lax.dot_general(
        x_ref[...], w_ref[...],
        dimension_numbers=(((1,), (0,)), ((), ())),
        preferred_element_type=jnp.float32,
    )
    _layernorm_epilogue(h, res_ref, consts_ref, o_ref, eps, inv_h)


def _kernel_ktiled(x_ref, res_ref, w_ref, consts_ref, o_ref, acc_ref, *,
                   eps, inv_h, n_k):
    k = pl.program_id(1)

    @pl.when(k == 0)
    def _():
        acc_ref[...] = jnp.zeros_like(acc_ref)

    acc_ref[...] += jax.lax.dot_general(
        x_ref[...], w_ref[...],
        dimension_numbers=(((1,), (0,)), ((), ())),
        preferred_element_type=jnp.float32,
    )

    @pl.when(k == n_k - 1)
    def _():
        _layernorm_epilogue(acc_ref[...], res_ref, consts_ref, o_ref, eps, inv_h)


# ---------------------------------------------------------------------------
# Tiling / VMEM budget
# ---------------------------------------------------------------------------

def _vmem_capacity_bytes():
    cap = 64 * 1024 * 1024  # conservative default (v7x per-TC VMEM)
    try:
        info = pltpu.get_tpu_info()
        cap = int(getattr(info, "vmem_capacity_bytes", cap)) or cap
    except Exception:
        pass
    return cap


def _choose_tiles(rows, H, bytes_x, bytes_r, bytes_w, bytes_o, budget,
                  tm_req, tk_force=None):
    def ws(tm_, tk_):
        b = 2 * tm_ * tk_ * bytes_x        # x tile (double-buffered)
        b += 2 * tm_ * H * bytes_r         # residual tile
        b += 2 * tk_ * H * bytes_w         # weight tile
        b += 2 * 8 * H * 4                 # packed consts (sublane-padded)
        b += 2 * tm_ * H * bytes_o         # output tile
        if tk_ < H:
            b += tm_ * H * 4               # f32 accumulator scratch (K-tiled)
        return b

    # Row tile: requested size, shrunk to the problem, multiple of 8.
    tm_eff = max(8, _round_up(min(int(tm_req), max(rows, 1)), 8))
    # Guarantee >= 2 row tiles so both v7x TensorCores get work.
    if rows >= 512:
        tm_eff = min(tm_eff, _round_up((rows + 1) // 2, 8))
    # Opportunistically grow to 1024 rows when there is plenty of work and
    # the (whole-weight) working set comfortably fits.
    while tm_eff < 1024 and rows >= 4 * tm_eff and ws(tm_eff * 2, H) <= budget:
        tm_eff *= 2

    # K tile: full H if it fits, otherwise the largest multiple of 128 that
    # divides H and fits the budget (keeps tm large instead of shrinking it).
    if tk_force is not None:
        tk = int(tk_force)
    else:
        candidates = [H] + sorted(
            {d for d in range(128, H, 128) if H % d == 0}, reverse=True)
        tk = next((t for t in candidates if ws(tm_eff, t) <= budget),
                  candidates[-1])

    # Last resort: shrink the row tile.
    while tm_eff > 8 and ws(tm_eff, tk) > budget:
        tm_eff = max(8, _round_up(tm_eff // 2, 8))

    return tm_eff, tk, ws(tm_eff, tk)


# ---------------------------------------------------------------------------
# pallas_call builder + public wrapper
# ---------------------------------------------------------------------------

def _build_call(rows_p, H, tm, tk, out_dtype, eps, vmem_limit, cost):
    inv_h = 1.0 / float(H)
    n_k = H // tk

    if n_k == 1:
        kernel = functools.partial(_kernel_single, eps=eps, inv_h=inv_h)
        grid = (rows_p // tm,)
        in_specs = [
            pl.BlockSpec((tm, H), lambda i: (i, 0)),    # hidden rows
            pl.BlockSpec((tm, H), lambda i: (i, 0)),    # residual rows
            pl.BlockSpec((H, H), lambda i: (0, 0)),     # weight (grid-invariant)
            pl.BlockSpec((3, H), lambda i: (0, 0)),     # bias / gamma / beta
        ]
        out_specs = pl.BlockSpec((tm, H), lambda i: (i, 0))
        scratch = []
        dims = ("parallel",)
    else:
        kernel = functools.partial(_kernel_ktiled, eps=eps, inv_h=inv_h, n_k=n_k)
        grid = (rows_p // tm, n_k)
        in_specs = [
            pl.BlockSpec((tm, tk), lambda i, k: (i, k)),
            pl.BlockSpec((tm, H), lambda i, k: (i, 0)),
            pl.BlockSpec((tk, H), lambda i, k: (k, 0)),
            pl.BlockSpec((3, H), lambda i, k: (0, 0)),
        ]
        out_specs = pl.BlockSpec((tm, H), lambda i, k: (i, 0))
        scratch = [pltpu.VMEM((tm, H), jnp.float32)]
        dims = ("parallel", "arbitrary")

    return pl.pallas_call(
        kernel,
        out_shape=jax.ShapeDtypeStruct((rows_p, H), out_dtype),
        grid_spec=pltpu.PrefetchScalarGridSpec(
            num_scalar_prefetch=0,
            grid=grid,
            in_specs=in_specs,
            out_specs=out_specs,
            scratch_shapes=scratch,
        ),
        compiler_params=pltpu.CompilerParams(
            dimension_semantics=dims,
            vmem_limit_bytes=vmem_limit,
        ),
        cost_estimate=cost,
    )


def diffuser_self_output(hidden_states, input_tensor, params, *, eps=1e-12,
                         tm=512, mxu_dtype=None, tk=None):
    """hidden_states, input_tensor: (B, S, H). params: dict of weights.

    mxu_dtype: optionally cast the matmul operands (x, dense_w) to this dtype
    (e.g. jnp.bfloat16) for the MXU; accumulation and the LN epilogue stay f32.
    tk: optional forced K tile (must divide H and be a multiple of 128, or H).
    """
    B, S, H = hidden_states.shape
    rows = B * S
    out_dtype = hidden_states.dtype

    x2 = hidden_states.reshape(rows, H)
    r2 = input_tensor.reshape(rows, H)

    # Pre-transpose the dense weight ONCE (PyTorch layout (out,in) -> (in,out));
    # a single H*H HBM op amortized over every grid step -- the kernel then
    # does a plain (1,0) contraction with no per-step relayout.
    wt = jnp.transpose(params["dense_w"])

    if mxu_dtype is not None:
        x2 = x2.astype(mxu_dtype)
        wt = wt.astype(mxu_dtype)

    bytes_x = jnp.dtype(x2.dtype).itemsize
    bytes_r = jnp.dtype(r2.dtype).itemsize
    bytes_w = jnp.dtype(wt.dtype).itemsize
    bytes_o = jnp.dtype(out_dtype).itemsize

    if tk is not None:
        if H % int(tk) != 0 or (int(tk) != H and int(tk) % 128 != 0):
            raise ValueError("tk must divide H and be a multiple of 128 (or H)")

    # Generation-aware VMEM budget: ~3/4 of physical capacity
    # (~48 MiB on v7x, ~96 MiB on v5e/v6e).
    vmem_cap = _vmem_capacity_bytes()
    budget = max(32 << 20, (vmem_cap * 3) // 4)

    tm_eff, tk_eff, ws_bytes = _choose_tiles(
        rows, H, bytes_x, bytes_r, bytes_w, bytes_o, budget, tm, tk_force=tk)

    rows_p = _round_up(rows, tm_eff)
    if rows_p != rows:
        pad = rows_p - rows
        x2 = jnp.pad(x2, ((0, pad), (0, 0)))
        r2 = jnp.pad(r2, ((0, pad), (0, 0)))

    consts = jnp.stack(
        [
            params["dense_b"].astype(jnp.float32),
            params["ln_gamma"].astype(jnp.float32),
            params["ln_beta"].astype(jnp.float32),
        ],
        axis=0,
    )  # (3, H)

    # vmem_limit: working set + headroom, capped 8 MiB below physical VMEM
    # (v7x: <= 56 MiB; v5e/v6e can go well above the 64 MiB old cap).
    vmem_limit = int(max(16 << 20,
                         min(vmem_cap - (8 << 20),
                             max(ws_bytes + (8 << 20), 32 << 20))))

    n_row_tiles = rows_p // tm_eff
    n_k = H // tk_eff
    weight_bytes = H * H * bytes_w * (n_row_tiles if n_k > 1 else 1)
    cost = pl.CostEstimate(
        flops=2 * rows_p * H * H + 10 * rows_p * H,
        transcendentals=rows_p,
        bytes_accessed=(
            rows_p * H * (bytes_x + bytes_r)   # x + residual reads
            + rows_p * H * bytes_o             # output write
            + weight_bytes                     # weight read(s)
            + 3 * H * 4                        # packed consts
        ),
    )

    call = _build_call(rows_p, H, tm_eff, tk_eff, out_dtype, eps, vmem_limit, cost)
    out2 = call(x2, r2, wt, consts)

    if rows_p != rows:
        out2 = out2[:rows]
    return out2.reshape(B, S, H)


# ---------------------------------------------------------------------------
# Reference + test
# ---------------------------------------------------------------------------

def _reference(hidden_states, input_tensor, params, eps=1e-12):
    h = (hidden_states.astype(jnp.float32)
         @ params["dense_w"].astype(jnp.float32).T
         + params["dense_b"].astype(jnp.float32))
    y = h + input_tensor.astype(jnp.float32)
    mean = jnp.mean(y, axis=-1, keepdims=True)
    var = jnp.mean((y - mean) ** 2, axis=-1, keepdims=True)
    norm = (y - mean) * jax.lax.rsqrt(var + eps)
    return norm * params["ln_gamma"].astype(jnp.float32) \
        + params["ln_beta"].astype(jnp.float32)


def _make_case(key, B, S, H, dtype):
    k_hs, k_res, k_w, k_b = jax.random.split(key, 4)
    hidden_states = jax.random.normal(k_hs, (B, S, H), dtype=jnp.float32).astype(dtype)
    input_tensor = jax.random.normal(k_res, (B, S, H), dtype=jnp.float32).astype(dtype)
    bound = 1.0 / (H ** 0.5)
    params = {
        "dense_w": jax.random.uniform(k_w, (H, H), jnp.float32, -bound, bound),
        "dense_b": jax.random.uniform(k_b, (H,), jnp.float32, -bound, bound),
        "ln_gamma": jnp.ones((H,), jnp.float32),
        "ln_beta": jnp.zeros((H,), jnp.float32),
    }
    return hidden_states, input_tensor, params


if __name__ == "__main__":
    eps = 1e-12
    root = jax.random.PRNGKey(0)
    k1, k2 = jax.random.split(root, 2)

    # --- Case 1: f32, small shape (B=2, S=8, H=32), whole-K path ----------
    B, S, H = 2, 8, 32
    hs, res, params = _make_case(k1, B, S, H, jnp.float32)

    out = diffuser_self_output(hs, res, params, eps=eps)
    out = jax.block_until_ready(out)
    ref = _reference(hs, res, params, eps=eps)
    assert out.shape == (B, S, H)
    assert jnp.allclose(out, ref, atol=1e-5, rtol=1e-5), "f32 mismatch vs reference"

    # --- Case 2: bf16 activations/weight (MXU-native, f32 accum + f32 LN) -
    params_bf16 = dict(params, dense_w=params["dense_w"].astype(jnp.bfloat16))
    out_bf16 = diffuser_self_output(
        hs.astype(jnp.bfloat16), res.astype(jnp.bfloat16), params_bf16, eps=eps)
    out_bf16 = jax.block_until_ready(out_bf16)
    assert out_bf16.shape == (B, S, H)
    assert jnp.all(jnp.isfinite(out_bf16.astype(jnp.float32)))
    assert jnp.allclose(out_bf16.astype(jnp.float32), ref,
                        atol=1.5e-1, rtol=1.5e-1), "bf16 mismatch vs reference"

    # --- Case 3: f32 model, bf16-fed MXU (mxu_dtype path) ------------------
    out_mxu = diffuser_self_output(hs, res, params, eps=eps, mxu_dtype=jnp.bfloat16)
    out_mxu = jax.block_until_ready(out_mxu)
    assert jnp.allclose(out_mxu, ref, atol=5e-2, rtol=5e-2), \
        "mxu_dtype=bf16 mismatch vs reference"

    # --- Case 4: K-tiled reduction path (H=256, forced tk=128) -------------
    B2, S2, H2 = 2, 8, 256
    hs2, res2, params2 = _make_case(k2, B2, S2, H2, jnp.float32)
    out_kt = diffuser_self_output(hs2, res2, params2, eps=eps, tk=128)
    out_kt = jax.block_until_ready(out_kt)
    ref2 = _reference(hs2, res2, params2, eps=eps)
    assert out_kt.shape == (B2, S2, H2)
    assert jnp.allclose(out_kt, ref2, atol=1e-4, rtol=1e-4), \
        "K-tiled mismatch vs reference"

    print("KERNEL_OK")
</pallas_src>

<mosaic_0001>
module attributes {stable_mosaic.version = 11 : i64} {
  func.func @_kernel_single(%arg0: i32, %arg1: memref<16x32xf32, #tpu.memory_space<vmem>>, %arg2: memref<16x32xf32, #tpu.memory_space<vmem>>, %arg3: memref<32x32xf32, #tpu.memory_space<vmem>>, %arg4: memref<3x32xf32, #tpu.memory_space<vmem>>, %arg5: memref<16x32xf32, #tpu.memory_space<vmem>>) attributes {dimension_semantics = [#tpu.dimension_semantics<parallel>], iteration_bounds = array<i64: 1>, scalar_prefetch = 0 : i64, scratch_operands = 0 : i64, tpu.core_type = #tpu.core_type<tc>, window_params = [{transform_indices = @transform_0, window_bounds = array<i64: 16, 32>}, {transform_indices = @transform_1, window_bounds = array<i64: 16, 32>}, {pipeline_mode = #tpu.pipeline_mode<synchronous>, transform_indices = @transform_2, window_bounds = array<i64: 32, 32>}, {pipeline_mode = #tpu.pipeline_mode<synchronous>, transform_indices = @transform_3, window_bounds = array<i64: 3, 32>}, {transform_indices = @transform_4, window_bounds = array<i64: 16, 32>}]} {
    %c0 = arith.constant 0 : index
    %c0_0 = arith.constant 0 : index
    %0 = vector.load %arg1[%c0, %c0_0] : memref<16x32xf32, #tpu.memory_space<vmem>>, vector<16x32xf32>
    %c0_1 = arith.constant 0 : index
    %c0_2 = arith.constant 0 : index
    %1 = vector.load %arg3[%c0_1, %c0_2] : memref<32x32xf32, #tpu.memory_space<vmem>>, vector<32x32xf32>
    %cst = arith.constant dense<0.000000e+00> : vector<16x32xf32>
    %2 = tpu.matmul %0, %1, %cst {dimension_numbers = #tpu.dot_dimension_numbers<[1], [0], [0], [1], [0, 0, 1, 1], [], []>} : vector<16x32xf32>, vector<32x32xf32>, vector<16x32xf32> -> vector<16x32xf32>
    %c0_3 = arith.constant 0 : index
    %c0_4 = arith.constant 0 : index
    %3 = vector.load %arg4[%c0_3, %c0_4] : memref<3x32xf32, #tpu.memory_space<vmem>>, vector<3x32xf32>
    %4 = vector.extract_strided_slice %3 {offsets = [0, 0], sizes = [1, 32], strides = [1, 1]} : vector<3x32xf32> to vector<1x32xf32>
    %5 = vector.extract_strided_slice %3 {offsets = [1, 0], sizes = [1, 32], strides = [1, 1]} : vector<3x32xf32> to vector<1x32xf32>
    %6 = vector.extract_strided_slice %3 {offsets = [2, 0], sizes = [1, 32], strides = [1, 1]} : vector<3x32xf32> to vector<1x32xf32>
    %7 = vector.broadcast %4 : vector<1x32xf32> to vector<16x32xf32>
    %8 = arith.addf %2, %7 : vector<16x32xf32>
    %c0_5 = arith.constant 0 : index
    %c0_6 = arith.constant 0 : index
    %9 = vector.load %arg2[%c0_5, %c0_6] : memref<16x32xf32, #tpu.memory_space<vmem>>, vector<16x32xf32>
    %10 = arith.addf %8, %9 : vector<16x32xf32>
    %cst_7 = arith.constant dense<0.000000e+00> : vector<16xf32>
    %11 = vector.multi_reduction <add>, %10, %cst_7 [1] : vector<16x32xf32> to vector<16xf32>
    %12 = vector.shape_cast %11 : vector<16xf32> to vector<16x1xf32>
    %cst_8 = arith.constant 3.125000e-02 : f32
    %13 = vector.broadcast %cst_8 : f32 to vector<16x1xf32>
    %14 = arith.mulf %12, %13 : vector<16x1xf32>
    %15 = arith.mulf %10, %10 : vector<16x32xf32>
    %cst_9 = arith.constant dense<0.000000e+00> : vector<16xf32>
    %16 = vector.multi_reduction <add>, %15, %cst_9 [1] : vector<16x32xf32> to vector<16xf32>
    %17 = vector.shape_cast %16 : vector<16xf32> to vector<16x1xf32>
    %cst_10 = arith.constant 3.125000e-02 : f32
    %18 = vector.broadcast %cst_10 : f32 to vector<16x1xf32>
    %19 = arith.mulf %17, %18 : vector<16x1xf32>
    %20 = arith.mulf %14, %14 : vector<16x1xf32>
    %21 = arith.subf %19, %20 : vector<16x1xf32>
    %cst_11 = arith.constant 0.000000e+00 : f32
    %22 = vector.broadcast %cst_11 : f32 to vector<16x1xf32>
    %23 = arith.maximumf %21, %22 : vector<16x1xf32>
    %cst_12 = arith.constant 9.99999996E-13 : f32
    %24 = vector.broadcast %cst_12 : f32 to vector<16x1xf32>
    %25 = arith.addf %23, %24 : vector<16x1xf32>
    %26 = math.rsqrt %25 : vector<16x1xf32>
    %27 = vector.broadcast %14 : vector<16x1xf32> to vector<16x32xf32>
    %28 = arith.subf %10, %27 : vector<16x32xf32>
    %29 = vector.broadcast %26 : vector<16x1xf32> to vector<16x32xf32>
    %30 = arith.mulf %28, %29 : vector<16x32xf32>
    %31 = vector.broadcast %5 : vector<1x32xf32> to vector<16x32xf32>
    %32 = arith.mulf %30, %31 : vector<16x32xf32>
    %33 = vector.broadcast %6 : vector<1x32xf32> to vector<16x32xf32>
    %34 = arith.addf %32, %33 : vector<16x32xf32>
    %c0_13 = arith.constant 0 : index
    %c0_14 = arith.constant 0 : index
    %35 = vector.load %arg5[%c0_13, %c0_14] : memref<16x32xf32, #tpu.memory_space<vmem>>, vector<16x32xf32>
    tpu.vector_store %arg5[%c0_13, %c0_14], %34 {strides = array<i32>} : memref<16x32xf32, #tpu.memory_space<vmem>>, vector<16x32xf32>,
    return
  }
  func.func @transform_0(%arg0: i32) -> (i32, i32) {
    %c0_i32 = arith.constant 0 : i32
    %c0_i32_0 = arith.constant 0 : i32
    return %arg0, %c0_i32 : i32, i32
  }
  func.func @transform_1(%arg0: i32) -> (i32, i32) {
    %c0_i32 = arith.constant 0 : i32
    %c0_i32_0 = arith.constant 0 : i32
    return %arg0, %c0_i32 : i32, i32
  }
  func.func @transform_2(%arg0: i32) -> (i32, i32) {
    %c0_i32 = arith.constant 0 : i32
    %c0_i32_0 = arith.constant 0 : i32
    %c0_i32_1 = arith.constant 0 : i32
    return %c0_i32, %c0_i32_0 : i32, i32
  }
  func.func @transform_3(%arg0: i32) -> (i32, i32) {
    %c0_i32 = arith.constant 0 : i32
    %c0_i32_0 = arith.constant 0 : i32
    %c0_i32_1 = arith.constant 0 : i32
    return %c0_i32, %c0_i32_0 : i32, i32
  }
  func.func @transform_4(%arg0: i32) -> (i32, i32) {
    %c0_i32 = arith.constant 0 : i32
    %c0_i32_0 = arith.constant 0 : i32
    return %arg0, %c0_i32 : i32, i32
  }
}

</mosaic_0001>

<bundles_post_ra>
// kernel: tpu_custom_call.1
= control target key start
LH: loop header
LB: loop body
LE: loop exit
PB: predicated region body
PF: predicated region fallthrough
CT: control target
= control target key end

     0   :  { %9 = vsyncpa [#allocation3], 0  ;;  %s401_s0 = inlined_call_operand.hbm [shape: f32[16,32], index: 0, kind: input, shape index: {}]   ;;  %s402_s1 = inlined_call_operand.hbm [shape: f32[16,32], index: 1, kind: input, shape index: {}]   ;;  %s403_s2 = inlined_call_operand.hbm [shape: f32[32,32], index: 2, kind: input, shape index: {}]   ;;  %s404_s3 = inlined_call_operand.vmem [shape: f32[3,32], index: 3, kind: input, shape index: {}]   ;;  %s405_s4 = inlined_call_operand.hbm [shape: f32[16,32], index: 4, kind: output, shape index: {}]  }
   0x1   :  { %10 = vsyncpa [#allocation6], 0 }
   0x2   :  { %11 = vsyncpa [#allocation4], 0  ;;  %s335_s15 = smov [#allocation5]   ;;  %s336_s17 = smov [#allocation2]  }
   0x3   :  { %s29_s16 = sshll.u32 %s335_s15, 4  ;;  %s17_s18 = sshll.u32 %s336_s17, 4  ;;  %s30_s16 = int_to_ptr.vmem [resolvable:$true] %s29_s16  ;;  %s18_s18 = int_to_ptr.vmem [resolvable:$true] %s17_s18 }
   0x4   :  { %s257_s19 = scalar_lea.vmem %s30_s16, 256  ;;  %p262_p1 = scmp.lt.s32.totalorder %s30_s16, %s30_s16 }
   0x5   :  { %p258_p0 = scmp.ne.s32.totalorder %s30_s16, %s257_s19  ;;  %p263_p2 = scmp.lt.s32.totalorder %s257_s19, %s257_s19 }
   0x7   :  { %p264_p3 = por %p263_p2, %p262_p1 }
   0x9   :  { %p265_p4 = pnand %p264_p3, %p258_p0 }
   0xb   :  { %268 = shalt.err (!%p265_p4)
}
   0xc   :  { %s337_s20 = smov 128   ;;  %s338_s21 = smov 8  }
   0xd   :  { %35 = dma.hbm_to_vmem [thread:$0]  %s402_s1, 256, %s30_s16, [#allocation6], %s337_s20, %s337_s20, %s338_s21  }
   0xe   :  { %s277_s24 = scalar_lea.vmem %s18_s18, 256  ;;  %p282_p6 = scmp.lt.s32.totalorder %s18_s18, %s18_s18 }
   0xf   :  { %p278_p5 = scmp.ne.s32.totalorder %s18_s18, %s277_s24  ;;  %p283_p7 = scmp.lt.s32.totalorder %s277_s24, %s277_s24 }
  0x11   :  { %p284_p8 = por %p283_p7, %p282_p6 }
  0x13   :  { %p285_p9 = pnand %p284_p8, %p278_p5 }
  0x15   :  { %288 = shalt.err (!%p285_p9)
}
  0x16   :  { %23 = dma.hbm_to_vmem [thread:$0]  %s401_s0, 256, %s18_s18, [#allocation3], %s337_s20, %s337_s20, %s338_s21  }
  0x17   :  { %s339_s27 = smov [#allocation7]  }
  0x18   :  { %s41_s28 = sshll.u32 %s339_s27, 4  ;;  %s42_s28 = int_to_ptr.vmem [resolvable:$true] %s41_s28 }
  0x19   :  { %s297_s29 = scalar_lea.vmem %s42_s28, 512  ;;  %p302_p11 = scmp.lt.s32.totalorder %s42_s28, %s42_s28 }
  0x1a   :  { %p298_p10 = scmp.ne.s32.totalorder %s42_s28, %s297_s29  ;;  %p303_p12 = scmp.lt.s32.totalorder %s297_s29, %s297_s29 }
  0x1c   :  { %p304_p13 = por %p303_p12, %p302_p11 }
  0x1e   :  { %p305_p0 = pnand %p304_p13, %p298_p10 }
  0x20   :  { %308 = shalt.err (!%p305_p0)
}
  0x21   :  { %47 = dma.hbm_to_vmem [thread:$0]  %s403_s2, 512, %s42_s28, [#allocation6], %s337_s20, %s337_s20, %s338_s21  }
  0x22   :  { %329 = dma.done.wait [#allocation3], 256  }
  0x23   :  { %330 = vsyncadd [#allocation3], 4294967040 }
  0x24   :  { %331 = dma.done.wait [#allocation6], 768  }
  0x25   :  { %332 = vsyncadd [#allocation6], 4294966528  ;;  %vm70_vm0 = vcmask 261120   ;;  %v64_v0 = vld [vmem:[#allocation7 + $0x18] sm:$0xff]  ;;  %v63_v1 = vld [vmem:[#allocation7 + $0x10] sm:$0xff]  ;;  %v66_v6 = vlaneseq }
  0x26   :  { %228 = vmatprep.subr.mxu0 %v64_v0  ;;  %v59_v2 = vld [vmem:[#allocation2] sm:$0xff]  ;;  %v62_v3 = vld [vmem:[#allocation7 + $0x8] sm:$0xff]  ;;  %v153_v13 = vld [vmem:[#allocation5 + $0x8] sm:$0xff] }
  0x27   :  { %229 = vmatpush3.msra.mxu0 %v64_v0  ;;  %236 = vmatprep.mubr.msk.f32.mxu0 %vm70_vm0, %v59_v2  ;;  %v61_v4 = vld [vmem:[#allocation7] sm:$0xff]  ;;  %v60_v5 = vld [vmem:[#allocation2 + $0x8] sm:$0xff]  ;;  %v67_v7 = vshrl.u32 %v66_v6, 7  ;;  %v152_v15 = vld [vmem:[#allocation5] sm:$0xff] }
  0x28   :  { %230 = vmatprep.subr.mxu0 %v63_v1  ;;  %v65_v9 = vld [vmem:[%s404_s3] sm:$0x7]  ;;  %s340_s3 = smov [#allocation8]  }
  0x29   :  { %231 = vmatpush3.msra.mxu0 %v63_v1  ;;  %v68_v8 = vsub.s32 0, %v67_v7  ;;  %v190_v41 = vsub.s32 1, %v67_v7  ;;  %v196_v42 = vsub.s32 2, %v67_v7  ;;  %s207_s5 = sshll.u32 %s340_s3, 4  ;;  %s208_s5 = int_to_ptr.vmem [resolvable:$true] %s207_s5 }
  0x2a   :  { %232 = vmatprep.subr.mxu0 %v62_v3  ;;  %s309_s6 = scalar_lea.vmem %s208_s5, 256  ;;  %p314_p2 = scmp.lt.s32.totalorder %s208_s5, %s208_s5 }
  0x2b   :  { %233 = vmatpush3.msra.mxu0 %v62_v3  ;;  %v69_v10 = vrot.slane %v65_v9, %v68_v8  ;;  %v191_v43 = vrot.slane %v65_v9, %v190_v41  ;;  %v197_v46 = vrot.slane %v65_v9, %v196_v42  ;;  %p310_p1 = scmp.ne.s32.totalorder %s208_s5, %s309_s6  ;;  %p315_p3 = scmp.lt.s32.totalorder %s309_s6, %s309_s6 }
  0x2c   :  { %234 = vmatprep.subr.mxu0 %v61_v4 }
  0x2d   :  { %235 = vmatpush3.msra.mxu0 %v61_v4  ;;  %p316_p4 = por %p315_p3, %p314_p2 }
  0x2e   :  { %237 = vmatmul.mubr.msk.f32.vlgmr.msra.gmra.mxu0 %vm70_vm0, %v60_v5 }
  0x2f   :  { %p317_p5 = pnand %p316_p4, %p310_p1 }
  0xee   :  { %v238_v11 = vpop.f32.mrf.mxu0 }
  0xef   :  { %v149_v12 = vadd.f32 %v238_v11, %v69_v10 }
  0xf0   :  { %v143_v14 = vpop.f32.mrf.mxu0 }
  0xf1   :  { %v144_v16 = vadd.f32 %v143_v14, %v69_v10  ;;  %v155_v17 = vadd.f32 %v153_v13, %v149_v12 }
  0xf3   :  { %v154_v18 = vadd.f32 %v152_v15, %v144_v16  ;;  %v165_v22 = vmul.f32 %v155_v17, %v155_v17  ;;  %v159_v23 = vsel %vm70_vm0, %v155_v17, 0.0 }
  0xf5   :  { %v156_v19 = vsel %vm70_vm0, %v154_v18, 0.0  ;;  %v164_v20 = vmul.f32 %v154_v18, %v154_v18  ;;  %v169_v24 = vsel %vm70_vm0, %v165_v22, 0.0 }
  0xf6   :  { %157 = vadd.xlane.f32.xlu0 %v156_v19 }
  0xf7   :  { %v166_v21 = vsel %vm70_vm0, %v164_v20, 0.0 }
  0xf8   :  { %167 = vadd.xlane.f32.xlu1 %v166_v21 }
  0xfa   :  { %160 = vadd.xlane.f32.xlu0 %v159_v23 }
  0xfc   :  { %170 = vadd.xlane.f32.xlu1 %v169_v24 }
 0x17f   :  { %v158_v25 = vpop.xlane.xlu0 %157 }
 0x180   :  { %v162_v26 = vmul.f32 0.03125, %v158_v25 }
 0x181   :  { %v168_v27 = vpop.xlane.xlu1 %167 }
 0x182   :  { %v174_v28 = vmul.f32 %v162_v26, %v162_v26  ;;  %v172_v29 = vmul.f32 0.03125, %v168_v27  ;;  %v184_v44 = vsub.f32 %v154_v18, %v162_v26 }
 0x183   :  { %v161_v30 = vpop.xlane.xlu0 %160 }
 0x184   :  { %v176_v31 = vsub.f32 %v172_v29, %v174_v28  ;;  %v163_v32 = vmul.f32 0.03125, %v161_v30 }
 0x185   :  { %v171_v33 = vpop.xlane.xlu1 %170 }
 0x186   :  { %v178_v34 = vmax.f32 %v176_v31, 0.0  ;;  %v175_v35 = vmul.f32 %v163_v32, %v163_v32  ;;  %v173_v36 = vmul.f32 0.03125, %v171_v33  ;;  %v185_v48 = vsub.f32 %v155_v17, %v163_v32 }
 0x188   :  { %v180_v37 = vadd.f32 1e-12, %v178_v34  ;;  %v177_v38 = vsub.f32 %v173_v36, %v175_v35 }
 0x18a   :  { %245 = vrsqrt.f32 %v180_v37  ;;  %v179_v39 = vmax.f32 %v177_v38, 0.0 }
 0x18c   :  { %v181_v40 = vadd.f32 1e-12, %v179_v39 }
 0x18e   :  { %247 = vrsqrt.f32 %v181_v40 }
 0x197   :  { %v246_v45 = vpop.eup %245 }
 0x198   :  { %v186_v47 = vmul.f32 %v246_v45, %v184_v44 }
 0x19a   :  { %v192_v49 = vmul.f32 %v191_v43, %v186_v47 }
 0x19b   :  { %v248_v50 = vpop.eup %247 }
 0x19c   :  { %v187_v51 = vmul.f32 %v248_v50, %v185_v48  ;;  %v198_v52 = vadd.f32 %v197_v46, %v192_v49 }
 0x19e   :  { %v193_v53 = vmul.f32 %v191_v43, %v187_v51  ;;  %200 = vst.msk [vmem:[#allocation8] sm:$0xff] %vm70_vm0, %v198_v52 }
 0x1a0   :  { %v199_v54 = vadd.f32 %v197_v46, %v193_v53 }
 0x1a2   :  { %201 = vst.msk [vmem:[#allocation8 + $0x8] sm:$0xff] %vm70_vm0, %v199_v54 }
 0x1a3   :  { %320 = shalt.err (!%p317_p5)
}
 0x1a4   :  { %213 = dma.vmem_to_hbm [thread:$0]  %s208_s5, 256, %s405_s4, [#allocation4], %s337_s20, %s337_s20, %s338_s21  }
 0x1a5   :  { %333 = dma.done.wait [#allocation4], 256  }
 0x1a6   :  { %334 = vsyncadd [#allocation4], 4294967040 }
 0x1a7   :  { %217 = vsyncpa [#allocation3], 1 }
 0x1a8   :  { %218 = vsyncpa [#allocation6], 1 }
 0x1a9   :  { %219 = vsyncpa [#allocation4], 1 }

</bundles_post_ra>
